<compile_context>
chip_gen: v7x
topology: tpu7x:2x2x1
jax: 0.10.0
libtpu: 0.0.40
codegen_flags: <defaults>
</compile_context>

<pallas_src>
import functools

import jax
import jax.numpy as jnp
from jax import lax
from jax.experimental import pallas as pl
from jax.experimental.pallas import tpu as pltpu

# TODO(synk): flip to jnp.bfloat16 to cut MXU pass count on the serial
# recurrent chain (v5e/v6e/v7x MXUs are bf16-native); requires loosening the
# 1e-4 allclose vs the f32 reference to ~1e-2, so the default stays f32.
_MATMUL_DTYPE = jnp.float32


def _make_kernel(seq, batch, units, hidden, layers, pred_len):
    H = hidden
    G = 4 * H
    L = layers

    def kernel(x_ref, wih0_ref, b_ref, wrec_ref, dw_ref, db_ref, out_ref):
        # x_ref:    (seq*batch, units)      layer-0 input sequence
        # wih0_ref: (units, 4H)             layer-0 input weights (g cols x2)
        # b_ref:    (L, 4H)                 per-layer b_ih+b_hh   (g cols x2)
        # wrec_ref: (L*H, L*4H)             fused block recurrent weights
        # dw_ref:   (1, H), db_ref: (1, 1)  dense head
        # out_ref:  (batch, 1)
        x = x_ref[...]
        b = b_ref[...]
        wrec = wrec_ref[...].astype(_MATMUL_DTYPE)

        # Hoisted layer-0 input projection + bias: one MXU matmul that sits
        # off the serial per-timestep chain.
        gx0 = jnp.dot(x.astype(_MATMUL_DTYPE),
                      wih0_ref[...].astype(_MATMUL_DTYPE),
                      preferred_element_type=jnp.float32) + b[0:1, :]

        h = [jnp.zeros((batch, H), jnp.float32) for _ in range(L)]
        c = [jnp.zeros((batch, H), jnp.float32) for _ in range(L)]
        h_sel = None

        def cell(gates, c_prev):
            # The g-block pre-activation is already scaled by 2, so a single
            # sigmoid pass yields i/f/o directly and tanh(g) = 2*sig_g - 1.
            sig = jax.nn.sigmoid(gates)
            i_g = sig[:, 0 * H:1 * H]
            f_g = sig[:, 1 * H:2 * H]
            g_t = 2.0 * sig[:, 2 * H:3 * H] - 1.0
            o_g = sig[:, 3 * H:4 * H]
            c_new = f_g * c_prev + i_g * g_t
            h_new = o_g * jnp.tanh(c_new)
            return h_new, c_new

        # Fully-unrolled diagonal wavefront: layer l runs timestep t = s - l.
        # All slice offsets are compile-time constants (sublane/lane aligned).
        for s in range(seq + L - 1):
            if s == 0:
                fused = None                       # all states zero: no matmul
            else:
                hcat = jnp.concatenate(h, axis=-1).astype(_MATMUL_DTYPE)
                fused = jnp.dot(hcat, wrec,
                                preferred_element_type=jnp.float32)
            for l in range(L):
                t = s - l
                if t < 0 or t >= seq:
                    continue                       # layer inactive this step
                if l == 0:
                    gates = gx0[t * batch:(t + 1) * batch, :]   # static slice
                else:
                    gates = b[l:l + 1, :]
                if fused is not None:
                    gates = gates + fused[:, l * G:(l + 1) * G]
                h[l], c[l] = cell(gates, c[l])
                if l == L - 1 and t == pred_len - 1:
                    h_sel = h[l]

        # Dense head (out_features=1) as VPU multiply + lane reduction; avoid
        # an N=1 MXU matmul.  ReLU applied in-kernel (commutes with the
        # wrapper's batch-index slice).
        dense = jnp.sum(h_sel * dw_ref[...], axis=-1, keepdims=True) + db_ref[...]
        out_ref[...] = jnp.maximum(dense, 0.0).astype(out_ref.dtype)

    return kernel


def _scale_g_columns(a, hidden, n_blocks):
    """Multiply the g-gate columns (cols [2H,3H) of every 4H block) by 2."""
    scale = jnp.ones((4 * hidden,), a.dtype).at[2 * hidden:3 * hidden].set(2.0)
    return a * jnp.tile(scale, n_blocks)


def lstm_predictor_forward(x, lstm_params, dense_w, dense_b, prediction_length):
    """x: (seq, batch, units) f32. Returns relu(dense(lstm(x))[pred-1, :pred])."""
    seq, batch, units = x.shape
    layers = len(lstm_params)
    hidden = lstm_params[0][1].shape[0]
    H, G, L = hidden, 4 * hidden, layers

    assert 1 <= prediction_length <= seq, "need seq >= prediction_length >= 1"
    assert batch >= prediction_length, "need batch >= prediction_length"

    # One-time wrapper-side weight transforms: fused block recurrent matrix
    # and x2 pre-scaling of the g-gate columns (for the one-sigmoid trick).
    wrec = jnp.zeros((L * H, L * G), jnp.float32)
    for l in range(L):
        _, w_hh, _ = lstm_params[l]
        wrec = wrec.at[l * H:(l + 1) * H, l * G:(l + 1) * G].set(w_hh)
        if l + 1 < L:
            w_ih_next = lstm_params[l + 1][0]                # (H, 4H)
            wrec = wrec.at[l * H:(l + 1) * H,
                           (l + 1) * G:(l + 2) * G].set(w_ih_next)
    wrec = _scale_g_columns(wrec, H, L)

    biases = jnp.concatenate([b for (_, _, b) in lstm_params], axis=0)  # (L,4H)
    biases = _scale_g_columns(biases, H, 1)
    wih0 = _scale_g_columns(lstm_params[0][0], H, 1)

    kernel = _make_kernel(seq, batch, units, hidden, layers, prediction_length)

    vmem = pl.BlockSpec(memory_space=pltpu.MemorySpace.VMEM)
    out = pl.pallas_call(
        kernel,
        out_shape=jax.ShapeDtypeStruct((batch, 1), jnp.float32),
        in_specs=[vmem] * 6,
        out_specs=vmem,
    )(
        x.astype(jnp.float32).reshape(seq * batch, units),
        wih0,
        biases,
        wrec,
        dense_w.reshape(1, hidden),
        dense_b.reshape(1, 1),
    )

    # out[pred_len - 1, range(pred_len)].squeeze(), already ReLU'd in-kernel.
    return out[:prediction_length, 0]


def lstm_predictor_reference(x, lstm_params, dense_w, dense_b, prediction_length):
    """Pure-JAX reference (same math as PyTorch nn.LSTM in eval mode)."""
    seq, batch, _ = x.shape
    inp = x
    for (w_ih, w_hh, b) in lstm_params:
        H = w_hh.shape[0]

        def step(carry, x_t, _w_ih=w_ih, _w_hh=w_hh, _b=b, _H=H):
            h, c = carry
            gates = x_t @ _w_ih + h @ _w_hh + _b
            i = jax.nn.sigmoid(gates[:, 0 * _H:1 * _H])
            f = jax.nn.sigmoid(gates[:, 1 * _H:2 * _H])
            g = jnp.tanh(gates[:, 2 * _H:3 * _H])
            o = jax.nn.sigmoid(gates[:, 3 * _H:4 * _H])
            c = f * c + i * g
            h = o * jnp.tanh(c)
            return (h, c), h

        h0 = jnp.zeros((batch, H), jnp.float32)
        c0 = jnp.zeros((batch, H), jnp.float32)
        _, inp = lax.scan(step, (h0, c0), inp)

    out = inp @ dense_w + dense_b                      # (seq, batch, 1)
    out = out[prediction_length - 1, :prediction_length, 0]
    return jnp.maximum(out, 0.0)


def init_params(key, units, hidden, layers):
    """Deterministic PyTorch-style init: U(-1/sqrt(H), 1/sqrt(H))."""
    bound = 1.0 / jnp.sqrt(jnp.float32(hidden))
    params = []
    for l in range(layers):
        in_dim = units if l == 0 else hidden
        key, k1, k2, k3, k4 = jax.random.split(key, 5)
        w_ih = jax.random.uniform(k1, (in_dim, 4 * hidden), jnp.float32,
                                  -bound, bound)
        w_hh = jax.random.uniform(k2, (hidden, 4 * hidden), jnp.float32,
                                  -bound, bound)
        b_ih = jax.random.uniform(k3, (4 * hidden,), jnp.float32, -bound, bound)
        b_hh = jax.random.uniform(k4, (4 * hidden,), jnp.float32, -bound, bound)
        b = (b_ih + b_hh).reshape(1, 4 * hidden)
        params.append((w_ih, w_hh, b))
    key, k5, k6 = jax.random.split(key, 3)
    dense_w = jax.random.uniform(k5, (hidden, 1), jnp.float32, -bound, bound)
    dense_b = jax.random.uniform(k6, (1, 1), jnp.float32, -bound, bound)
    return key, params, dense_w, dense_b


if __name__ == "__main__":
    # Small shapes consistent with the module: seq=8, batch=8, units=4,
    # hidden_dim=32, layers=2, prediction_length=4 (needs seq >= pred_len and
    # batch >= pred_len because of out[pred_len-1, range(pred_len)]).
    seq, batch, units = 8, 8, 4
    hidden, layers, pred_len = 32, 2, 4

    key = jax.random.PRNGKey(0)
    key, lstm_params, dense_w, dense_b = init_params(key, units, hidden, layers)
    key, kx = jax.random.split(key)
    x = jax.random.normal(kx, (seq, batch, units), jnp.float32)

    fwd = jax.jit(functools.partial(lstm_predictor_forward,
                                    prediction_length=pred_len))
    out = fwd(x, lstm_params, dense_w, dense_b)
    out = jax.block_until_ready(out)

    ref = lstm_predictor_reference(x, lstm_params, dense_w, dense_b, pred_len)
    ref = jax.block_until_ready(ref)

    assert out.shape == (pred_len,)
    assert jnp.allclose(out, ref, atol=1e-4, rtol=1e-4), (out, ref)
    print("KERNEL_OK")
</pallas_src>

<mosaic_0001>
module attributes {stable_mosaic.version = 11 : i64} {
  func.func @kernel(%arg0: memref<64x4xf32, #tpu.memory_space<vmem>>, %arg1: memref<4x128xf32, #tpu.memory_space<vmem>>, %arg2: memref<2x128xf32, #tpu.memory_space<vmem>>, %arg3: memref<64x256xf32, #tpu.memory_space<vmem>>, %arg4: memref<1x32xf32, #tpu.memory_space<vmem>>, %arg5: memref<1x1xf32, #tpu.memory_space<vmem>>, %arg6: memref<8x1xf32, #tpu.memory_space<vmem>>) attributes {dimension_semantics = [], scalar_prefetch = 0 : i64, scratch_operands = 0 : i64, tpu.core_type = #tpu.core_type<tc>} {
    %c0 = arith.constant 0 : index
    %c0_0 = arith.constant 0 : index
    %0 = vector.load %arg0[%c0, %c0_0] : memref<64x4xf32, #tpu.memory_space<vmem>>, vector<64x4xf32>
    %c0_1 = arith.constant 0 : index
    %c0_2 = arith.constant 0 : index
    %1 = vector.load %arg2[%c0_1, %c0_2] : memref<2x128xf32, #tpu.memory_space<vmem>>, vector<2x128xf32>
    %c0_3 = arith.constant 0 : index
    %c0_4 = arith.constant 0 : index
    %2 = vector.load %arg3[%c0_3, %c0_4] : memref<64x256xf32, #tpu.memory_space<vmem>>, vector<64x256xf32>
    %c0_5 = arith.constant 0 : index
    %c0_6 = arith.constant 0 : index
    %3 = vector.load %arg1[%c0_5, %c0_6] : memref<4x128xf32, #tpu.memory_space<vmem>>, vector<4x128xf32>
    %cst = arith.constant dense<0.000000e+00> : vector<64x128xf32>
    %4 = tpu.matmul %0, %3, %cst {dimension_numbers = #tpu.dot_dimension_numbers<[1], [0], [0], [1], [0, 0, 1, 1], [], []>} : vector<64x4xf32>, vector<4x128xf32>, vector<64x128xf32> -> vector<64x128xf32>
    %5 = vector.extract_strided_slice %1 {offsets = [0, 0], sizes = [1, 128], strides = [1, 1]} : vector<2x128xf32> to vector<1x128xf32>
    %6 = vector.broadcast %5 : vector<1x128xf32> to vector<64x128xf32>
    %7 = arith.addf %4, %6 : vector<64x128xf32>
    %cst_7 = arith.constant 0.000000e+00 : f32
    %8 = vector.broadcast %cst_7 : f32 to vector<8x32xf32>
    %cst_8 = arith.constant 0.000000e+00 : f32
    %9 = vector.broadcast %cst_8 : f32 to vector<8x32xf32>
    %cst_9 = arith.constant 0.000000e+00 : f32
    %10 = vector.broadcast %cst_9 : f32 to vector<8x32xf32>
    %11 = vector.extract_strided_slice %7 {offsets = [0, 0], sizes = [8, 128], strides = [1, 1]} : vector<64x128xf32> to vector<8x128xf32>
    %12 = arith.negf %11 : vector<8x128xf32>
    %13 = math.exp %12 : vector<8x128xf32>
    %cst_10 = arith.constant 1.000000e+00 : f32
    %14 = vector.broadcast %cst_10 : f32 to vector<8x128xf32>
    %15 = arith.addf %14, %13 : vector<8x128xf32>
    %16 = arith.divf %14, %15 : vector<8x128xf32>
    %17 = vector.extract_strided_slice %16 {offsets = [0, 0], sizes = [8, 32], strides = [1, 1]} : vector<8x128xf32> to vector<8x32xf32>
    %18 = vector.extract_strided_slice %16 {offsets = [0, 32], sizes = [8, 32], strides = [1, 1]} : vector<8x128xf32> to vector<8x32xf32>
    %19 = vector.extract_strided_slice %16 {offsets = [0, 64], sizes = [8, 32], strides = [1, 1]} : vector<8x128xf32> to vector<8x32xf32>
    %cst_11 = arith.constant 2.000000e+00 : f32
    %20 = vector.broadcast %cst_11 : f32 to vector<8x32xf32>
    %21 = arith.mulf %20, %19 : vector<8x32xf32>
    %cst_12 = arith.constant 1.000000e+00 : f32
    %22 = vector.broadcast %cst_12 : f32 to vector<8x32xf32>
    %23 = arith.subf %21, %22 : vector<8x32xf32>
    %24 = vector.extract_strided_slice %16 {offsets = [0, 96], sizes = [8, 32], strides = [1, 1]} : vector<8x128xf32> to vector<8x32xf32>
    %25 = arith.mulf %18, %9 : vector<8x32xf32>
    %26 = arith.mulf %17, %23 : vector<8x32xf32>
    %27 = arith.addf %25, %26 : vector<8x32xf32>
    %28 = math.tanh %27 : vector<8x32xf32>
    %29 = arith.mulf %24, %28 : vector<8x32xf32>
    %30 = tpu.concatenate %29, %8 in 1 : vector<8x32xf32>, vector<8x32xf32> -> vector<8x64xf32>
    %cst_13 = arith.constant dense<0.000000e+00> : vector<8x256xf32>
    %31 = tpu.matmul %30, %2, %cst_13 {dimension_numbers = #tpu.dot_dimension_numbers<[1], [0], [0], [1], [0, 0, 1, 1], [], []>} : vector<8x64xf32>, vector<64x256xf32>, vector<8x256xf32> -> vector<8x256xf32>
    %32 = vector.extract_strided_slice %7 {offsets = [8, 0], sizes = [8, 128], strides = [1, 1]} : vector<64x128xf32> to vector<8x128xf32>
    %33 = vector.extract_strided_slice %31 {offsets = [0, 0], sizes = [8, 128], strides = [1, 1]} : vector<8x256xf32> to vector<8x128xf32>
    %34 = arith.addf %32, %33 : vector<8x128xf32>
    %35 = arith.negf %34 : vector<8x128xf32>
    %36 = math.exp %35 : vector<8x128xf32>
    %cst_14 = arith.constant 1.000000e+00 : f32
    %37 = vector.broadcast %cst_14 : f32 to vector<8x128xf32>
    %38 = arith.addf %37, %36 : vector<8x128xf32>
    %39 = arith.divf %37, %38 : vector<8x128xf32>
    %40 = vector.extract_strided_slice %39 {offsets = [0, 0], sizes = [8, 32], strides = [1, 1]} : vector<8x128xf32> to vector<8x32xf32>
    %41 = vector.extract_strided_slice %39 {offsets = [0, 32], sizes = [8, 32], strides = [1, 1]} : vector<8x128xf32> to vector<8x32xf32>
    %42 = vector.extract_strided_slice %39 {offsets = [0, 64], sizes = [8, 32], strides = [1, 1]} : vector<8x128xf32> to vector<8x32xf32>
    %cst_15 = arith.constant 2.000000e+00 : f32
    %43 = vector.broadcast %cst_15 : f32 to vector<8x32xf32>
    %44 = arith.mulf %43, %42 : vector<8x32xf32>
    %cst_16 = arith.constant 1.000000e+00 : f32
    %45 = vector.broadcast %cst_16 : f32 to vector<8x32xf32>
    %46 = arith.subf %44, %45 : vector<8x32xf32>
    %47 = vector.extract_strided_slice %39 {offsets = [0, 96], sizes = [8, 32], strides = [1, 1]} : vector<8x128xf32> to vector<8x32xf32>
    %48 = arith.mulf %41, %27 : vector<8x32xf32>
    %49 = arith.mulf %40, %46 : vector<8x32xf32>
    %50 = arith.addf %48, %49 : vector<8x32xf32>
    %51 = math.tanh %50 : vector<8x32xf32>
    %52 = arith.mulf %47, %51 : vector<8x32xf32>
    %53 = vector.extract_strided_slice %1 {offsets = [1, 0], sizes = [1, 128], strides = [1, 1]} : vector<2x128xf32> to vector<1x128xf32>
    %54 = vector.extract_strided_slice %31 {offsets = [0, 128], sizes = [8, 128], strides = [1, 1]} : vector<8x256xf32> to vector<8x128xf32>
    %55 = vector.broadcast %53 : vector<1x128xf32> to vector<8x128xf32>
    %56 = arith.addf %55, %54 : vector<8x128xf32>
    %57 = arith.negf %56 : vector<8x128xf32>
    %58 = math.exp %57 : vector<8x128xf32>
    %cst_17 = arith.constant 1.000000e+00 : f32
    %59 = vector.broadcast %cst_17 : f32 to vector<8x128xf32>
    %60 = arith.addf %59, %58 : vector<8x128xf32>
    %61 = arith.divf %59, %60 : vector<8x128xf32>
    %62 = vector.extract_strided_slice %61 {offsets = [0, 0], sizes = [8, 32], strides = [1, 1]} : vector<8x128xf32> to vector<8x32xf32>
    %63 = vector.extract_strided_slice %61 {offsets = [0, 32], sizes = [8, 32], strides = [1, 1]} : vector<8x128xf32> to vector<8x32xf32>
    %64 = vector.extract_strided_slice %61 {offsets = [0, 64], sizes = [8, 32], strides = [1, 1]} : vector<8x128xf32> to vector<8x32xf32>
    %cst_18 = arith.constant 2.000000e+00 : f32
    %65 = vector.broadcast %cst_18 : f32 to vector<8x32xf32>
    %66 = arith.mulf %65, %64 : vector<8x32xf32>
    %cst_19 = arith.constant 1.000000e+00 : f32
    %67 = vector.broadcast %cst_19 : f32 to vector<8x32xf32>
    %68 = arith.subf %66, %67 : vector<8x32xf32>
    %69 = vector.extract_strided_slice %61 {offsets = [0, 96], sizes = [8, 32], strides = [1, 1]} : vector<8x128xf32> to vector<8x32xf32>
    %70 = arith.mulf %63, %10 : vector<8x32xf32>
    %71 = arith.mulf %62, %68 : vector<8x32xf32>
    %72 = arith.addf %70, %71 : vector<8x32xf32>
    %73 = math.tanh %72 : vector<8x32xf32>
    %74 = arith.mulf %69, %73 : vector<8x32xf32>
    %75 = tpu.concatenate %52, %74 in 1 : vector<8x32xf32>, vector<8x32xf32> -> vector<8x64xf32>
    %cst_20 = arith.constant dense<0.000000e+00> : vector<8x256xf32>
    %76 = tpu.matmul %75, %2, %cst_20 {dimension_numbers = #tpu.dot_dimension_numbers<[1], [0], [0], [1], [0, 0, 1, 1], [], []>} : vector<8x64xf32>, vector<64x256xf32>, vector<8x256xf32> -> vector<8x256xf32>
    %77 = vector.extract_strided_slice %7 {offsets = [16, 0], sizes = [8, 128], strides = [1, 1]} : vector<64x128xf32> to vector<8x128xf32>
    %78 = vector.extract_strided_slice %76 {offsets = [0, 0], sizes = [8, 128], strides = [1, 1]} : vector<8x256xf32> to vector<8x128xf32>
    %79 = arith.addf %77, %78 : vector<8x128xf32>
    %80 = arith.negf %79 : vector<8x128xf32>
    %81 = math.exp %80 : vector<8x128xf32>
    %cst_21 = arith.constant 1.000000e+00 : f32
    %82 = vector.broadcast %cst_21 : f32 to vector<8x128xf32>
    %83 = arith.addf %82, %81 : vector<8x128xf32>
    %84 = arith.divf %82, %83 : vector<8x128xf32>
    %85 = vector.extract_strided_slice %84 {offsets = [0, 0], sizes = [8, 32], strides = [1, 1]} : vector<8x128xf32> to vector<8x32xf32>
    %86 = vector.extract_strided_slice %84 {offsets = [0, 32], sizes = [8, 32], strides = [1, 1]} : vector<8x128xf32> to vector<8x32xf32>
    %87 = vector.extract_strided_slice %84 {offsets = [0, 64], sizes = [8, 32], strides = [1, 1]} : vector<8x128xf32> to vector<8x32xf32>
    %cst_22 = arith.constant 2.000000e+00 : f32
    %88 = vector.broadcast %cst_22 : f32 to vector<8x32xf32>
    %89 = arith.mulf %88, %87 : vector<8x32xf32>
    %cst_23 = arith.constant 1.000000e+00 : f32
    %90 = vector.broadcast %cst_23 : f32 to vector<8x32xf32>
    %91 = arith.subf %89, %90 : vector<8x32xf32>
    %92 = vector.extract_strided_slice %84 {offsets = [0, 96], sizes = [8, 32], strides = [1, 1]} : vector<8x128xf32> to vector<8x32xf32>
    %93 = arith.mulf %86, %50 : vector<8x32xf32>
    %94 = arith.mulf %85, %91 : vector<8x32xf32>
    %95 = arith.addf %93, %94 : vector<8x32xf32>
    %96 = math.tanh %95 : vector<8x32xf32>
    %97 = arith.mulf %92, %96 : vector<8x32xf32>
    %98 = vector.extract_strided_slice %1 {offsets = [1, 0], sizes = [1, 128], strides = [1, 1]} : vector<2x128xf32> to vector<1x128xf32>
    %99 = vector.extract_strided_slice %76 {offsets = [0, 128], sizes = [8, 128], strides = [1, 1]} : vector<8x256xf32> to vector<8x128xf32>
    %100 = vector.broadcast %98 : vector<1x128xf32> to vector<8x128xf32>
    %101 = arith.addf %100, %99 : vector<8x128xf32>
    %102 = arith.negf %101 : vector<8x128xf32>
    %103 = math.exp %102 : vector<8x128xf32>
    %cst_24 = arith.constant 1.000000e+00 : f32
    %104 = vector.broadcast %cst_24 : f32 to vector<8x128xf32>
    %105 = arith.addf %104, %103 : vector<8x128xf32>
    %106 = arith.divf %104, %105 : vector<8x128xf32>
    %107 = vector.extract_strided_slice %106 {offsets = [0, 0], sizes = [8, 32], strides = [1, 1]} : vector<8x128xf32> to vector<8x32xf32>
    %108 = vector.extract_strided_slice %106 {offsets = [0, 32], sizes = [8, 32], strides = [1, 1]} : vector<8x128xf32> to vector<8x32xf32>
    %109 = vector.extract_strided_slice %106 {offsets = [0, 64], sizes = [8, 32], strides = [1, 1]} : vector<8x128xf32> to vector<8x32xf32>
    %cst_25 = arith.constant 2.000000e+00 : f32
    %110 = vector.broadcast %cst_25 : f32 to vector<8x32xf32>
    %111 = arith.mulf %110, %109 : vector<8x32xf32>
    %cst_26 = arith.constant 1.000000e+00 : f32
    %112 = vector.broadcast %cst_26 : f32 to vector<8x32xf32>
    %113 = arith.subf %111, %112 : vector<8x32xf32>
    %114 = vector.extract_strided_slice %106 {offsets = [0, 96], sizes = [8, 32], strides = [1, 1]} : vector<8x128xf32> to vector<8x32xf32>
    %115 = arith.mulf %108, %72 : vector<8x32xf32>
    %116 = arith.mulf %107, %113 : vector<8x32xf32>
    %117 = arith.addf %115, %116 : vector<8x32xf32>
    %118 = math.tanh %117 : vector<8x32xf32>
    %119 = arith.mulf %114, %118 : vector<8x32xf32>
    %120 = tpu.concatenate %97, %119 in 1 : vector<8x32xf32>, vector<8x32xf32> -> vector<8x64xf32>
    %cst_27 = arith.constant dense<0.000000e+00> : vector<8x256xf32>
    %121 = tpu.matmul %120, %2, %cst_27 {dimension_numbers = #tpu.dot_dimension_numbers<[1], [0], [0], [1], [0, 0, 1, 1], [], []>} : vector<8x64xf32>, vector<64x256xf32>, vector<8x256xf32> -> vector<8x256xf32>
    %122 = vector.extract_strided_slice %7 {offsets = [24, 0], sizes = [8, 128], strides = [1, 1]} : vector<64x128xf32> to vector<8x128xf32>
    %123 = vector.extract_strided_slice %121 {offsets = [0, 0], sizes = [8, 128], strides = [1, 1]} : vector<8x256xf32> to vector<8x128xf32>
    %124 = arith.addf %122, %123 : vector<8x128xf32>
    %125 = arith.negf %124 : vector<8x128xf32>
    %126 = math.exp %125 : vector<8x128xf32>
    %cst_28 = arith.constant 1.000000e+00 : f32
    %127 = vector.broadcast %cst_28 : f32 to vector<8x128xf32>
    %128 = arith.addf %127, %126 : vector<8x128xf32>
    %129 = arith.divf %127, %128 : vector<8x128xf32>
    %130 = vector.extract_strided_slice %129 {offsets = [0, 0], sizes = [8, 32], strides = [1, 1]} : vector<8x128xf32> to vector<8x32xf32>
    %131 = vector.extract_strided_slice %129 {offsets = [0, 32], sizes = [8, 32], strides = [1, 1]} : vector<8x128xf32> to vector<8x32xf32>
    %132 = vector.extract_strided_slice %129 {offsets = [0, 64], sizes = [8, 32], strides = [1, 1]} : vector<8x128xf32> to vector<8x32xf32>
    %cst_29 = arith.constant 2.000000e+00 : f32
    %133 = vector.broadcast %cst_29 : f32 to vector<8x32xf32>
    %134 = arith.mulf %133, %132 : vector<8x32xf32>
    %cst_30 = arith.constant 1.000000e+00 : f32
    %135 = vector.broadcast %cst_30 : f32 to vector<8x32xf32>
    %136 = arith.subf %134, %135 : vector<8x32xf32>
    %137 = vector.extract_strided_slice %129 {offsets = [0, 96], sizes = [8, 32], strides = [1, 1]} : vector<8x128xf32> to vector<8x32xf32>
    %138 = arith.mulf %131, %95 : vector<8x32xf32>
    %139 = arith.mulf %130, %136 : vector<8x32xf32>
    %140 = arith.addf %138, %139 : vector<8x32xf32>
    %141 = math.tanh %140 : vector<8x32xf32>
    %142 = arith.mulf %137, %141 : vector<8x32xf32>
    %143 = vector.extract_strided_slice %1 {offsets = [1, 0], sizes = [1, 128], strides = [1, 1]} : vector<2x128xf32> to vector<1x128xf32>
    %144 = vector.extract_strided_slice %121 {offsets = [0, 128], sizes = [8, 128], strides = [1, 1]} : vector<8x256xf32> to vector<8x128xf32>
    %145 = vector.broadcast %143 : vector<1x128xf32> to vector<8x128xf32>
    %146 = arith.addf %145, %144 : vector<8x128xf32>
    %147 = arith.negf %146 : vector<8x128xf32>
    %148 = math.exp %147 : vector<8x128xf32>
    %cst_31 = arith.constant 1.000000e+00 : f32
    %149 = vector.broadcast %cst_31 : f32 to vector<8x128xf32>
    %150 = arith.addf %149, %148 : vector<8x128xf32>
    %151 = arith.divf %149, %150 : vector<8x128xf32>
    %152 = vector.extract_strided_slice %151 {offsets = [0, 0], sizes = [8, 32], strides = [1, 1]} : vector<8x128xf32> to vector<8x32xf32>
    %153 = vector.extract_strided_slice %151 {offsets = [0, 32], sizes = [8, 32], strides = [1, 1]} : vector<8x128xf32> to vector<8x32xf32>
    %154 = vector.extract_strided_slice %151 {offsets = [0, 64], sizes = [8, 32], strides = [1, 1]} : vector<8x128xf32> to vector<8x32xf32>
    %cst_32 = arith.constant 2.000000e+00 : f32
    %155 = vector.broadcast %cst_32 : f32 to vector<8x32xf32>
    %156 = arith.mulf %155, %154 : vector<8x32xf32>
    %cst_33 = arith.constant 1.000000e+00 : f32
    %157 = vector.broadcast %cst_33 : f32 to vector<8x32xf32>
    %158 = arith.subf %156, %157 : vector<8x32xf32>
    %159 = vector.extract_strided_slice %151 {offsets = [0, 96], sizes = [8, 32], strides = [1, 1]} : vector<8x128xf32> to vector<8x32xf32>
    %160 = arith.mulf %153, %117 : vector<8x32xf32>
    %161 = arith.mulf %152, %158 : vector<8x32xf32>
    %162 = arith.addf %160, %161 : vector<8x32xf32>
    %163 = math.tanh %162 : vector<8x32xf32>
    %164 = arith.mulf %159, %163 : vector<8x32xf32>
    %165 = tpu.concatenate %142, %164 in 1 : vector<8x32xf32>, vector<8x32xf32> -> vector<8x64xf32>
    %cst_34 = arith.constant dense<0.000000e+00> : vector<8x256xf32>
    %166 = tpu.matmul %165, %2, %cst_34 {dimension_numbers = #tpu.dot_dimension_numbers<[1], [0], [0], [1], [0, 0, 1, 1], [], []>} : vector<8x64xf32>, vector<64x256xf32>, vector<8x256xf32> -> vector<8x256xf32>
    %167 = vector.extract_strided_slice %1 {offsets = [1, 0], sizes = [1, 128], strides = [1, 1]} : vector<2x128xf32> to vector<1x128xf32>
    %168 = vector.extract_strided_slice %166 {offsets = [0, 128], sizes = [8, 128], strides = [1, 1]} : vector<8x256xf32> to vector<8x128xf32>
    %169 = vector.broadcast %167 : vector<1x128xf32> to vector<8x128xf32>
    %170 = arith.addf %169, %168 : vector<8x128xf32>
    %171 = arith.negf %170 : vector<8x128xf32>
    %172 = math.exp %171 : vector<8x128xf32>
    %cst_35 = arith.constant 1.000000e+00 : f32
    %173 = vector.broadcast %cst_35 : f32 to vector<8x128xf32>
    %174 = arith.addf %173, %172 : vector<8x128xf32>
    %175 = arith.divf %173, %174 : vector<8x128xf32>
    %176 = vector.extract_strided_slice %175 {offsets = [0, 0], sizes = [8, 32], strides = [1, 1]} : vector<8x128xf32> to vector<8x32xf32>
    %177 = vector.extract_strided_slice %175 {offsets = [0, 32], sizes = [8, 32], strides = [1, 1]} : vector<8x128xf32> to vector<8x32xf32>
    %178 = vector.extract_strided_slice %175 {offsets = [0, 64], sizes = [8, 32], strides = [1, 1]} : vector<8x128xf32> to vector<8x32xf32>
    %cst_36 = arith.constant 2.000000e+00 : f32
    %179 = vector.broadcast %cst_36 : f32 to vector<8x32xf32>
    %180 = arith.mulf %179, %178 : vector<8x32xf32>
    %cst_37 = arith.constant 1.000000e+00 : f32
    %181 = vector.broadcast %cst_37 : f32 to vector<8x32xf32>
    %182 = arith.subf %180, %181 : vector<8x32xf32>
    %183 = vector.extract_strided_slice %175 {offsets = [0, 96], sizes = [8, 32], strides = [1, 1]} : vector<8x128xf32> to vector<8x32xf32>
    %184 = arith.mulf %177, %162 : vector<8x32xf32>
    %185 = arith.mulf %176, %182 : vector<8x32xf32>
    %186 = arith.addf %184, %185 : vector<8x32xf32>
    %187 = math.tanh %186 : vector<8x32xf32>
    %188 = arith.mulf %183, %187 : vector<8x32xf32>
    %c0_38 = arith.constant 0 : index
    %c0_39 = arith.constant 0 : index
    %189 = vector.load %arg4[%c0_38, %c0_39] : memref<1x32xf32, #tpu.memory_space<vmem>>, vector<1x32xf32>
    %190 = vector.broadcast %189 : vector<1x32xf32> to vector<8x32xf32>
    %191 = arith.mulf %188, %190 : vector<8x32xf32>
    %cst_40 = arith.constant dense<0.000000e+00> : vector<8xf32>
    %192 = vector.multi_reduction <add>, %191, %cst_40 [1] : vector<8x32xf32> to vector<8xf32>
    %193 = vector.shape_cast %192 : vector<8xf32> to vector<8x1xf32>
    %c0_41 = arith.constant 0 : index
    %c0_42 = arith.constant 0 : index
    %194 = vector.load %arg5[%c0_41, %c0_42] : memref<1x1xf32, #tpu.memory_space<vmem>>, vector<1x1xf32>
    %195 = vector.broadcast %194 : vector<1x1xf32> to vector<8x1xf32>
    %196 = arith.addf %193, %195 : vector<8x1xf32>
    %cst_43 = arith.constant 0.000000e+00 : f32
    %197 = vector.broadcast %cst_43 : f32 to vector<8x1xf32>
    %198 = arith.maximumf %196, %197 : vector<8x1xf32>
    %c0_44 = arith.constant 0 : index
    %c0_45 = arith.constant 0 : index
    %199 = vector.load %arg6[%c0_44, %c0_45] : memref<8x1xf32, #tpu.memory_space<vmem>>, vector<8x1xf32>
    tpu.vector_store %arg6[%c0_44, %c0_45], %198 {strides = array<i32>} : memref<8x1xf32, #tpu.memory_space<vmem>>, vector<8x1xf32>,
    return
  }
}

</mosaic_0001>

<bundles_post_ra>
// kernel: lstm_predictor_forward.1
= control target key start
LH: loop header
LB: loop body
LE: loop exit
PB: predicated region body
PF: predicated region fallthrough
CT: control target
= control target key end

     0   :  { %vm80_vm0 = vcmask 1043456   ;;  %vm55_vm1 = vcmask 31744   ;;  %v51_v3 = vlaneseq  ;;  %s927_s28 = smov 64   ;;  %v929_v47 = vmov 0.0   ;;  %s930_s25 = smov 96   ;;  %s1186_s1 = inlined_call_operand.vmem [shape: f32[4,128], index: 1, kind: input, shape index: {}]   ;;  %s1187_s0 = inlined_call_operand.vmem [shape: f32[64,4], index: 0, kind: input, shape index: {}]   ;;  %s1188_s2 = inlined_call_operand.vmem [shape: f32[2,128], index: 2, kind: input, shape index: {}]   ;;  %s1189_s3 = inlined_call_operand.vmem [shape: f32[64,256], index: 3, kind: input, shape index: {}]   ;;  %s1190_s4 = inlined_call_operand.vmem [shape: f32[1,32], index: 4, kind: input, shape index: {}]   ;;  %s1191_s5 = inlined_call_operand.<no memory space> [shape: f32[1,1], index: 5, kind: input, shape index: {}]   ;;  %s1192_s6 = inlined_call_operand.vmem [shape: f32[8,1], index: 6, kind: output, shape index: {}]  }
   0x1   :  { %v50_v0 = vld [vmem:[%s1186_s1] sm:$0xf]  ;;  %v26_v2 = vld [vmem:[%s1187_s0 + $0x8] sm:$0xff]  ;;  %v37_v23 = vld [vmem:[%s1189_s3 + $0x18] sm:$0xff]  ;;  %284 = vmatprep.mubr.f32.mxu1 %v929_v47  ;;  %vm214_vm2 = vcmask 261120   ;;  %vm216_vm3 = vcmask 523264  }
   0x2   :  { %v25_v1 = vld [vmem:[%s1187_s0] sm:$0xff]  ;;  %797 = vmatprep.subr.msk.mxu0 %vm80_vm0, %v50_v0  ;;  %v977_v4 = vshrl.u32 %v51_v3, 7  ;;  %v35_v22 = vld [vmem:[%s1189_s3 + $0x8] sm:$0xff]  ;;  %v36_v26 = vld [vmem:[%s1189_s3 + $0x10] sm:$0xff]  ;;  %vm751_vm4 = vcmask 7168  }
   0x3   :  { %799 = vmatprep.mubr.msk.f32.mxu0 %vm55_vm1, %v25_v1  ;;  %798 = vmatpush3.msk.msra.mxu0 %vm80_vm0, %v50_v0  ;;  %v983_v6 = vld [vmem:[%s1188_s2] sm:$0x3]  ;;  %s928_s2 = smov 32   ;;  %v811_v25 = vpack.c.bf16 %v37_v23, %v35_v22  ;;  %v39_v27 = vld [vmem:[%s1189_s3 + $0x28] sm:$0xff]  ;;  %v41_v28 = vld [vmem:[%s1189_s3 + $0x38] sm:$0xff] }
   0x4   :  { %800 = vmatmul.mubr.msk.f32.vlgmr.msra.gmra.mrb[0].mxu0 %vm55_vm1, %v26_v2  ;;  %v53_v5 = vsub.s32 0, %v977_v4  ;;  %v34_v24 = vld [vmem:[%s1189_s3] sm:$0xff]  ;;  %v1016_v30 = vpack.c.bf16 %v41_v28, %v39_v27  ;;  %v40_v32 = vld [vmem:[%s1189_s3 + $0x30] sm:$0xff]  ;;  %v43_v33 = vld [vmem:[%s1189_s3 + $0x48] sm:$0xff]  ;;  %v319_v52 = vsub.s32 1, %v977_v4 }
   0x5   :  { %v1014_v29 = vpack.c.bf16 %v36_v26, %v34_v24  ;;  %v38_v31 = vld [vmem:[%s1189_s3 + $0x20] sm:$0xff]  ;;  %812 = vmatprep.subr.bf16.mxu1 %v811_v25  ;;  %v45_v34 = vld [vmem:[%s1189_s3 + $0x58] sm:$0xff]  ;;  %828 = vmatprep.subr.bf16.mxu0 %v811_v25  ;;  %v44_v38 = vld [vmem:[%s1189_s3 + $0x50] sm:$0xff] }
   0x6   :  { %v986_v7 = vrot.slane %v983_v6, %v53_v5  ;;  %v1031_v35 = vpack.c.bf16 %v40_v32, %v38_v31  ;;  %v1035_v36 = vpack.c.bf16 %v45_v34, %v43_v33  ;;  %v42_v37 = vld [vmem:[%s1189_s3 + $0x40] sm:$0xff]  ;;  %v47_v39 = vld [vmem:[%s1189_s3 + $0x68] sm:$0xff]  ;;  %v49_v40 = vld [vmem:[%s1189_s3 + $0x78] sm:$0xff]  ;;  %v1087_v53 = vrot.slane %v983_v6, %v319_v52 }
   0x7   :  { %814 = vmatpush1.bf16.msra.mxu1 %v1014_v29  ;;  %830 = vmatpush1.bf16.msra.mxu0 %v1014_v29  ;;  %v1051_v41 = vpack.c.bf16 %v44_v38, %v42_v37  ;;  %v1055_v43 = vpack.c.bf16 %v49_v40, %v47_v39  ;;  %v46_v44 = vld [vmem:[%s1189_s3 + $0x60] sm:$0xff]  ;;  %v48_v45 = vld [vmem:[%s1189_s3 + $0x70] sm:$0xff]  ;;  %v32_v23 = vld [vmem:[%s1187_s0 + $0x38] sm:$0xff] }
   0x8   :  { %816 = vmatprep.subr.bf16.mxu1 %v1016_v30  ;;  %832 = vmatprep.subr.bf16.mxu0 %v1016_v30  ;;  %v1066_v46 = vpack.c.bf16 %v48_v45, %v46_v44  ;;  %v31_v22 = vld [vmem:[%s1187_s0 + $0x30] sm:$0xff] }
   0xb   :  { %818 = vmatpush1.bf16.msra.mxu1 %v1031_v35  ;;  %834 = vmatpush1.bf16.msra.mxu0 %v1031_v35 }
   0xc   :  { %820 = vmatprep.subr.bf16.mxu1 %v1035_v36  ;;  %836 = vmatprep.subr.bf16.mxu0 %v1035_v36 }
   0xf   :  { %822 = vmatpush1.bf16.msra.mxu1 %v1051_v41  ;;  %838 = vmatpush1.bf16.msra.mxu0 %v1051_v41 }
  0x10   :  { %824 = vmatprep.subr.bf16.mxu1 %v1055_v43  ;;  %840 = vmatprep.subr.bf16.mxu0 %v1055_v43 }
  0x13   :  { %826 = vmatpush1.bf16.msra.mxu1 %v1066_v46  ;;  %842 = vmatpush1.bf16.msra.mxu0 %v1066_v46 }
  0x14   :  { %844 = vmatprep.subr.bf16.mxu1 %v811_v25  ;;  %860 = vmatprep.subr.bf16.mxu0 %v811_v25 }
  0xd7   :  { %v988_v8 = vpop.f32.mrb[0].mxu0 }
  0xd8   :  { %v150_v9 = vpop.f32.mrb[1].mxu0  ;;  %v156_v54 = vadd.f32 %v988_v8, %v986_v7 }
  0xd9   :  { %v151_v10 = vadd.f32 %v150_v9, %v986_v7 }
  0xdb   :  { %v766_v11 = vmul.f32 -1.442695, %v151_v10 }
  0xdd   :  { %879 = vpow2.f32 %v766_v11 }
  0xe7   :  { %v880_v12 = vpop.eup %879 }
  0xe8   :  { %v188_v13 = vadd.f32 1.0, %v880_v12 }
  0xea   :  { %881 = vrcp.f32 %v188_v13 }
  0xf4   :  { %v882_v14 = vpop.eup %881 }
  0xf5   :  { %v191_v15 = vmul.f32 2.0, %v882_v14  ;;  %v193_v19 = vmul.f32 0.0, %v882_v14 }
  0xf7   :  { %v767_v16 = vadd.f32 -1.0, %v191_v15 }
  0xf9   :  { %195 = vrot.lane.b32.xlu0 %v767_v16, %s927_s28 }
 0x16b   :  { %v196_v17 = vpop.permute.xlu0 %195 }
 0x16c   :  { %v198_v18 = vmul.f32 %v882_v14, %v196_v17 }
 0x16e   :  { %200 = vrot.lane.b32.xlu0 %v198_v18, %s928_s2  ;;  %v27_v18 = vld [vmem:[%s1187_s0 + $0x10] sm:$0xff] }
 0x16f   :  { %802 = vmatprep.mubr.msk.f32.mxu0 %vm55_vm1, %v27_v18 }
 0x1e0   :  { %v201_v20 = vpop.permute.xlu0 %200 }
 0x1e1   :  { %v993_v21 = vadd.f32 %v201_v20, %v193_v19  ;;  %v28_v19 = vld [vmem:[%s1187_s0 + $0x18] sm:$0xff]  ;;  %v29_v20 = vld [vmem:[%s1187_s0 + $0x20] sm:$0xff] }
 0x1e2   :  { %803 = vmatmul.mubr.msk.f32.gmra.mrb[2].mxu0 %vm55_vm1, %v28_v19 }
 0x1e3   :  { %883 = vtanh.f32 %v993_v21  ;;  %805 = vmatprep.mubr.msk.f32.mxu0 %vm55_vm1, %v29_v20 }
 0x1ed   :  { %v884_v42 = vpop.eup %883 }
 0x1ee   :  { %206 = vrot.lane.b32.xlu1 %v884_v42, %s927_s28 }
 0x260   :  { %v207_v48 = vpop.permute.xlu1 %206 }
 0x261   :  { %v209_v49 = vmul.f32 %v882_v14, %v207_v48 }
 0x263   :  { %211 = vrot.lane.b32.xlu1 %v209_v49, %s928_s2 }
 0x2b5   :  { %v1132_v32 = vpop.f32.mrb[2].mxu0 }
 0x2b6   :  { %v160_v33 = vpop.f32.mrb[3].mxu0 }
 0x2b7   :  { %v161_v45 = vadd.f32 %v160_v33, %v986_v7 }
 0x2d5   :  { %v212_v50 = vpop.permute.xlu1 %211 }
 0x2d6   :  { %v215_v51 = vsel %vm214_vm2, %v212_v50, 0.0 }
 0x2d7   :  { %768 = vmatmul.mubr.msk.f32.vlgmr.msra.gmra.mrb[0].mxu1 %vm216_vm3, %v215_v51 }
 0x2d8   :  { %846 = vmatpush1.bf16.msra.mxu1 %v1014_v29  ;;  %558 = vmatprep.mubr.f32.mxu1 %v929_v47 }
 0x2d9   :  { %848 = vmatprep.subr.bf16.mxu1 %v1016_v30 }
 0x2dc   :  { %850 = vmatpush1.bf16.msra.mxu1 %v1031_v35 }
 0x2dd   :  { %852 = vmatprep.subr.bf16.mxu1 %v1035_v36 }
 0x2e0   :  { %854 = vmatpush1.bf16.msra.mxu1 %v1051_v41 }
 0x2e1   :  { %856 = vmatprep.subr.bf16.mxu1 %v1055_v43 }
 0x2e4   :  { %858 = vmatpush1.bf16.msra.mxu1 %v1066_v46 }
 0x3aa   :  { %v286_v55 = vpop.f32.mrb[0].mxu1 }
 0x3ab   :  { %v291_v56 = vadd.f32 %v286_v55, %v156_v54  ;;  %v288_v57 = vpop.f32.mrb[1].mxu1 }
 0x3ac   :  { %v321_v58 = vadd.f32 %v1087_v53, %v288_v57 }
 0x3ad   :  { %v769_v59 = vmul.f32 -1.442695, %v291_v56 }
 0x3ae   :  { %v771_v60 = vmul.f32 -1.442695, %v321_v58 }
 0x3af   :  { %885 = vpow2.f32 %v769_v59 }
 0x3b0   :  { %887 = vpow2.f32 %v771_v60 }
 0x3b9   :  { %v886_v61 = vpop.eup %885 }
 0x3ba   :  { %v888_v62 = vpop.eup %887  ;;  %v295_v63 = vadd.f32 1.0, %v886_v61 }
 0x3bb   :  { %v325_v0 = vadd.f32 1.0, %v888_v62 }
 0x3bc   :  { %889 = vrcp.f32 %v295_v63 }
 0x3bd   :  { %891 = vrcp.f32 %v325_v0 }
 0x3c6   :  { %v890_v1 = vpop.eup %889 }
 0x3c7   :  { %v892_v2 = vpop.eup %891  ;;  %v298_v3 = vmul.f32 2.0, %v890_v1  ;;  %v300_v12 = vmul.f32 %v890_v1, %v993_v21  ;;  %v30_v21 = vld [vmem:[%s1187_s0 + $0x28] sm:$0xff] }
 0x3c8   :  { %v328_v4 = vmul.f32 2.0, %v892_v2  ;;  %v330_v14 = vmul.f32 0.0, %v892_v2  ;;  %806 = vmatmul.mubr.msk.f32.gmra.mrb[4].mxu0 %vm55_vm1, %v30_v21 }
 0x3c9   :  { %v770_v5 = vadd.f32 -1.0, %v298_v3  ;;  %808 = vmatprep.mubr.msk.f32.mxu0 %vm55_vm1, %v31_v22 }
 0x3ca   :  { %v772_v6 = vadd.f32 -1.0, %v328_v4 }
 0x3cb   :  { %302 = vrot.lane.b32.xlu0 %v770_v5, %s927_s28 }
 0x3cc   :  { %332 = vrot.lane.b32.xlu1 %v772_v6, %s927_s28  ;;  %809 = vmatmul.mubr.msk.f32.gmra.mrb[6].mxu0 %vm55_vm1, %v32_v23 }
 0x3cd   :  { %423 = vmatprep.mubr.f32.mxu0 %v929_v47 }
 0x43d   :  { %v303_v8 = vpop.permute.xlu0 %302 }
 0x43e   :  { %v305_v9 = vmul.f32 %v890_v1, %v303_v8  ;;  %v333_v10 = vpop.permute.xlu1 %332 }
 0x43f   :  { %v335_v11 = vmul.f32 %v892_v2, %v333_v10 }
 0x440   :  { %307 = vrot.lane.b32.xlu0 %v305_v9, %s928_s2 }
 0x441   :  { %337 = vrot.lane.b32.xlu1 %v335_v11, %s928_s2 }
 0x49b   :  { %v807_v34 = vpop.f32.mrb[4].mxu0 }
 0x49c   :  { %v170_v37 = vpop.f32.mrb[5].mxu0 }
 0x49f   :  { %v810_v38 = vpop.f32.mrb[6].mxu0 }
 0x4a0   :  { %v178_v39 = vpop.f32.mrb[7].mxu0 }
 0x4b2   :  { %v308_v13 = vpop.permute.xlu0 %307 }
 0x4b3   :  { %v1097_v15 = vadd.f32 %v308_v13, %v300_v12  ;;  %v338_v16 = vpop.permute.xlu1 %337  ;;  %v166_v13 = vadd.f32 %v1132_v32, %v986_v7 }
 0x4b4   :  { %v1099_v17 = vadd.f32 %v338_v16, %v330_v14 }
 0x4b5   :  { %893 = vtanh.f32 %v1097_v15 }
 0x4b6   :  { %895 = vtanh.f32 %v1099_v17 }
 0x4bf   :  { %v894_v24 = vpop.eup %893 }
 0x4c0   :  { %v896_v25 = vpop.eup %895  ;;  %313 = vrot.lane.b32.xlu0 %v894_v24, %s927_s28 }
 0x4c1   :  { %343 = vrot.lane.b32.xlu1 %v896_v25, %s927_s28 }
 0x532   :  { %v314_v26 = vpop.permute.xlu0 %313 }
 0x533   :  { %v316_v27 = vmul.f32 %v890_v1, %v314_v26  ;;  %v344_v28 = vpop.permute.xlu1 %343 }
 0x534   :  { %v346_v31 = vmul.f32 %v892_v2, %v344_v28 }
 0x535   :  { %348 = vrot.lane.b32.xlu0 %v316_v27, %s928_s2 }
 0x536   :  { %352 = vrot.lane.b32.xlu1 %v346_v31, %s927_s28 }
 0x5a7   :  { %v349_v40 = vpop.permute.xlu0 %348 }
 0x5a8   :  { %v353_v42 = vpop.permute.xlu1 %352 }
 0x5a9   :  { %v355_v44 = vsel %vm214_vm2, %v349_v40, %v353_v42 }
 0x5aa   :  { %773 = vmatmul.mubr.msk.f32.vlgmr.msra.gmra.mrb[8].mxu0 %vm216_vm3, %v355_v44 }
 0x5ab   :  { %862 = vmatpush1.bf16.msra.mxu0 %v1014_v29  ;;  %693 = vmatprep.mubr.f32.mxu0 %v929_v47 }
 0x5ac   :  { %864 = vmatprep.subr.bf16.mxu0 %v1016_v30 }
 0x5af   :  { %866 = vmatpush1.bf16.msra.mxu0 %v1031_v35 }
 0x5b0   :  { %868 = vmatprep.subr.bf16.mxu0 %v1035_v36 }
 0x5b3   :  { %870 = vmatpush1.bf16.msra.mxu0 %v1051_v41 }
 0x5b4   :  { %872 = vmatprep.subr.bf16.mxu0 %v1055_v43 }
 0x5b7   :  { %874 = vmatpush1.bf16.msra.mxu0 %v1066_v46 }
 0x67d   :  { %v425_v48 = vpop.f32.mrb[8].mxu0 }
 0x67e   :  { %v430_v49 = vadd.f32 %v425_v48, %v161_v45  ;;  %v427_v50 = vpop.f32.mrb[9].mxu0 }
 0x67f   :  { %v456_v29 = vadd.f32 %v427_v50, %v1087_v53 }
 0x680   :  { %v774_v47 = vmul.f32 -1.442695, %v430_v49 }
 0x681   :  { %v776_v51 = vmul.f32 -1.442695, %v456_v29 }
 0x682   :  { %897 = vpow2.f32 %v774_v47 }
 0x683   :  { %899 = vpow2.f32 %v776_v51 }
 0x68c   :  { %v898_v30 = vpop.eup %897 }
 0x68d   :  { %v900_v35 = vpop.eup %899  ;;  %v434_v36 = vadd.f32 1.0, %v898_v30 }
 0x68e   :  { %v460_v52 = vadd.f32 1.0, %v900_v35 }
 0x68f   :  { %901 = vrcp.f32 %v434_v36 }
 0x690   :  { %903 = vrcp.f32 %v460_v52 }
 0x699   :  { %v902_v41 = vpop.eup %901 }
 0x69a   :  { %v904_v43 = vpop.eup %903  ;;  %v437_v46 = vmul.f32 2.0, %v902_v41  ;;  %v439_v61 = vmul.f32 %v902_v41, %v1097_v15 }
 0x69b   :  { %v463_v54 = vmul.f32 2.0, %v904_v43  ;;  %v465_v63 = vmul.f32 %v904_v43, %v1099_v17 }
 0x69c   :  { %v775_v55 = vadd.f32 -1.0, %v437_v46 }
 0x69d   :  { %v777_v56 = vadd.f32 -1.0, %v463_v54 }
 0x69e   :  { %441 = vrot.lane.b32.xlu0 %v775_v55, %s927_s28 }
 0x69f   :  { %467 = vrot.lane.b32.xlu1 %v777_v56, %s927_s28 }
 0x710   :  { %v442_v57 = vpop.permute.xlu0 %441 }
 0x711   :  { %v444_v58 = vmul.f32 %v902_v41, %v442_v57  ;;  %v468_v59 = vpop.permute.xlu1 %467 }
 0x712   :  { %v470_v60 = vmul.f32 %v904_v43, %v468_v59 }
 0x713   :  { %446 = vrot.lane.b32.xlu0 %v444_v58, %s928_s2 }
 0x714   :  { %472 = vrot.lane.b32.xlu1 %v470_v60, %s928_s2  ;;  %v786_v60 = vld [vmem:[%s1190_s4] ss:$0 sm:$0xff] }
 0x785   :  { %v447_v62 = vpop.permute.xlu0 %446 }
 0x786   :  { %v449_v0 = vadd.f32 %v447_v62, %v439_v61  ;;  %v473_v1 = vpop.permute.xlu1 %472 }
 0x787   :  { %v475_v2 = vadd.f32 %v473_v1, %v465_v63 }
 0x788   :  { %905 = vtanh.f32 %v449_v0 }
 0x789   :  { %907 = vtanh.f32 %v475_v2 }
 0x792   :  { %v906_v3 = vpop.eup %905 }
 0x793   :  { %v908_v4 = vpop.eup %907  ;;  %452 = vrot.lane.b32.xlu0 %v906_v3, %s927_s28 }
 0x794   :  { %478 = vrot.lane.b32.xlu1 %v908_v4, %s927_s28 }
 0x805   :  { %v453_v5 = vpop.permute.xlu0 %452 }
 0x806   :  { %v455_v6 = vmul.f32 %v902_v41, %v453_v5  ;;  %v479_v8 = vpop.permute.xlu1 %478 }
 0x807   :  { %v481_v9 = vmul.f32 %v904_v43, %v479_v8 }
 0x808   :  { %483 = vrot.lane.b32.xlu0 %v455_v6, %s928_s2 }
 0x809   :  { %487 = vrot.lane.b32.xlu1 %v481_v9, %s927_s28 }
 0x87a   :  { %v484_v10 = vpop.permute.xlu0 %483 }
 0x87b   :  { %v488_v11 = vpop.permute.xlu1 %487 }
 0x87c   :  { %v490_v12 = vsel %vm214_vm2, %v484_v10, %v488_v11 }
 0x87d   :  { %778 = vmatmul.mubr.msk.f32.vlgmr.msra.gmra.mrb[2].mxu1 %vm216_vm3, %v490_v12 }
 0x950   :  { %v560_v14 = vpop.f32.mrb[2].mxu1 }
 0x951   :  { %v565_v15 = vadd.f32 %v560_v14, %v166_v13  ;;  %v562_v16 = vpop.f32.mrb[3].mxu1 }
 0x952   :  { %v591_v17 = vadd.f32 %v562_v16, %v1087_v53 }
 0x953   :  { %v779_v18 = vmul.f32 -1.442695, %v565_v15 }
 0x954   :  { %v781_v19 = vmul.f32 -1.442695, %v591_v17 }
 0x955   :  { %909 = vpow2.f32 %v779_v18 }
 0x956   :  { %911 = vpow2.f32 %v781_v19 }
 0x95f   :  { %v910_v20 = vpop.eup %909 }
 0x960   :  { %v912_v21 = vpop.eup %911  ;;  %v569_v22 = vadd.f32 1.0, %v910_v20 }
 0x961   :  { %v595_v23 = vadd.f32 1.0, %v912_v21 }
 0x962   :  { %913 = vrcp.f32 %v569_v22 }
 0x963   :  { %915 = vrcp.f32 %v595_v23 }
 0x96c   :  { %v914_v24 = vpop.eup %913 }
 0x96d   :  { %v916_v25 = vpop.eup %915  ;;  %v572_v26 = vmul.f32 2.0, %v914_v24  ;;  %v574_v37 = vmul.f32 %v914_v24, %v449_v0  ;;  %v11_v0 = vstv %s1191_s5 }
 0x96e   :  { %v598_v27 = vmul.f32 2.0, %v916_v25  ;;  %v600_v39 = vmul.f32 %v916_v25, %v475_v2  ;;  %12 = vst [vmem:[#allocation2] sm:$0x1] %v11_v0 }
 0x96f   :  { %v780_v7 = vadd.f32 -1.0, %v572_v26 }
 0x970   :  { %v782_v28 = vadd.f32 -1.0, %v598_v27 }
 0x971   :  { %576 = vrot.lane.b32.xlu0 %v780_v7, %s927_s28 }
 0x972   :  { %602 = vrot.lane.b32.xlu1 %v782_v28, %s927_s28 }
 0x975   :  { %v787_v8 = vld [vmem:[#allocation2] ss:$0 sm:$0xff] }
 0x9e3   :  { %v577_v31 = vpop.permute.xlu0 %576 }
 0x9e4   :  { %v579_v32 = vmul.f32 %v914_v24, %v577_v31  ;;  %v603_v33 = vpop.permute.xlu1 %602 }
 0x9e5   :  { %v605_v34 = vmul.f32 %v916_v25, %v603_v33 }
 0x9e6   :  { %581 = vrot.lane.b32.xlu0 %v579_v32, %s928_s2 }
 0x9e7   :  { %607 = vrot.lane.b32.xlu1 %v605_v34, %s928_s2 }
 0xa58   :  { %v582_v38 = vpop.permute.xlu0 %581 }
 0xa59   :  { %v584_v40 = vadd.f32 %v582_v38, %v574_v37  ;;  %v608_v42 = vpop.permute.xlu1 %607 }
 0xa5a   :  { %v610_v44 = vadd.f32 %v608_v42, %v600_v39 }
 0xa5b   :  { %917 = vtanh.f32 %v584_v40 }
 0xa5c   :  { %919 = vtanh.f32 %v610_v44 }
 0xa65   :  { %v918_v45 = vpop.eup %917 }
 0xa66   :  { %v920_v48 = vpop.eup %919  ;;  %587 = vrot.lane.b32.xlu0 %v918_v45, %s927_s28 }
 0xa67   :  { %613 = vrot.lane.b32.xlu1 %v920_v48, %s927_s28 }
 0xad8   :  { %v588_v49 = vpop.permute.xlu0 %587 }
 0xad9   :  { %v590_v50 = vmul.f32 %v914_v24, %v588_v49  ;;  %v614_v29 = vpop.permute.xlu1 %613 }
 0xada   :  { %v616_v47 = vmul.f32 %v916_v25, %v614_v29 }
 0xadb   :  { %618 = vrot.lane.b32.xlu0 %v590_v50, %s928_s2 }
 0xadc   :  { %622 = vrot.lane.b32.xlu1 %v616_v47, %s927_s28 }
 0xb4d   :  { %v619_v51 = vpop.permute.xlu0 %618 }
 0xb4e   :  { %v623_v30 = vpop.permute.xlu1 %622 }
 0xb4f   :  { %v625_v35 = vsel %vm214_vm2, %v619_v51, %v623_v30 }
 0xb50   :  { %783 = vmatmul.mubr.msk.f32.vlgmr.msra.gmra.mrb[10].mxu0 %vm216_vm3, %v625_v35 }
 0xc23   :  { %v695_v36 = vpop.f32.mrb[10].mxu0 }
 0xc24   :  { %v696_v52 = vpop.f32.mrb[11].mxu0 }
 0xc25   :  { %v699_v41 = vadd.f32 %v696_v52, %v1087_v53 }
 0xc27   :  { %v784_v43 = vmul.f32 -1.442695, %v699_v41 }
 0xc29   :  { %921 = vpow2.f32 %v784_v43 }
 0xc33   :  { %v922_v46 = vpop.eup %921 }
 0xc34   :  { %v703_v54 = vadd.f32 1.0, %v922_v46 }
 0xc36   :  { %923 = vrcp.f32 %v703_v54 }
 0xc40   :  { %v924_v55 = vpop.eup %923 }
 0xc41   :  { %v706_v56 = vmul.f32 2.0, %v924_v55  ;;  %v708_v53 = vmul.f32 %v924_v55, %v610_v44 }
 0xc43   :  { %v785_v57 = vadd.f32 -1.0, %v706_v56 }
 0xc45   :  { %710 = vrot.lane.b32.xlu0 %v785_v57, %s927_s28 }
 0xcb7   :  { %v711_v58 = vpop.permute.xlu0 %710 }
 0xcb8   :  { %v713_v59 = vmul.f32 %v924_v55, %v711_v58 }
 0xcba   :  { %715 = vrot.lane.b32.xlu1 %v713_v59, %s928_s2 }
 0xcbe   :  { %731 = vrot.lane.b32.xlu1 %v786_v60, %s930_s25 }
 0xd2c   :  { %v716_v61 = vpop.permute.xlu1 %715 }
 0xd2d   :  { %v718_v62 = vadd.f32 %v716_v61, %v708_v53 }
 0xd2f   :  { %925 = vtanh.f32 %v718_v62 }
 0xd30   :  { %v732_v2 = vpop.permute.xlu1 %731 }
 0xd39   :  { %v926_v63 = vpop.eup %925 }
 0xd3a   :  { %721 = vrot.lane.b32.xlu0 %v926_v63, %s927_s28 }
 0xdac   :  { %v722_v1 = vpop.permute.xlu0 %721 }
 0xdad   :  { %v724_v3 = vmul.f32 %v924_v55, %v722_v1 }
 0xdaf   :  { %v734_v4 = vmul.f32 %v732_v2, %v724_v3 }
 0xdb1   :  { %736 = vrot.lane.b32.xlu0 %v734_v4, %s928_s2 }
 0xe23   :  { %v737_v5 = vpop.permute.xlu0 %736 }
 0xe24   :  { %v739_v6 = vsel %vm214_vm2, %v737_v5, 0.0 }
 0xe25   :  { %740 = vadd.xlane.f32.xlu1 %v739_v6 }
 0xeb2   :  { %v741_v9 = vpop.xlane.xlu1 %740 }
 0xeb3   :  { %v749_v10 = vadd.f32 %v787_v8, %v741_v9 }
 0xeb5   :  { %v750_v11 = vmax.f32 %v749_v10, 0.0 }
 0xeb7   :  { %752 = vst.msk [vmem:[%s1192_s6] sm:$0xff] %vm751_vm4, %v750_v11 }

</bundles_post_ra>
